<compile_context>
chip_gen: v5e
topology: v5e:2x2
jax: 0.10.0
libtpu: 0.0.40
codegen_flags: <defaults>
</compile_context>

<pallas_src>
import jax
import jax.numpy as jnp
from jax.experimental import pallas as pl
from jax.experimental.pallas import tpu as pltpu


def _proj_kernel(patches_ref, w_ref, b_ref, o_ref, acc_ref):
    """One (tm, tn) tile of `patches @ W + b`, accumulated over the K grid axis."""
    k = pl.program_id(2)

    @pl.when(k == 0)
    def _():
        acc_ref[...] = jnp.zeros_like(acc_ref)

    acc_ref[...] += jnp.dot(patches_ref[...], w_ref[...],
                            preferred_element_type=jnp.float32)

    @pl.when(k == pl.num_programs(2) - 1)
    def _():
        o_ref[...] = (acc_ref[...] + b_ref[0, :].astype(jnp.float32)).astype(o_ref.dtype)


def hybrid_embed_forward(feat, proj_w, proj_b, patch_size, *, tm=128, tn=128, tk=512,
                         out_dtype=None):
    """Pallas HybridEmbed projection.

    Args:
      feat:   (B, C, H, W) backbone feature map (NCHW, PyTorch layout).
      proj_w: (E, C, p, p) Conv2d weight (kernel == stride == patch_size).
      proj_b: (E,)         Conv2d bias.
    Returns:
      (tokens, (H // p, W // p)) with tokens of shape (B, N, E), N = (H//p)*(W//p),
      matching `self.proj(x).flatten(2).transpose(1, 2)`.
    """
    p = patch_size
    B, C, H, W = feat.shape
    E = proj_w.shape[0]
    assert H % p == 0 and W % p == 0, "feature map must be divisible by patch_size"
    Hp, Wp = H // p, W // p
    N = Hp * Wp
    K = C * p * p
    out_dtype = out_dtype or feat.dtype

    # ---- layout plumbing (zero FLOPs): non-overlapping patches, batch folded into M ----
    # patches[b, i, j, k] with k = c*p*p + kh*p + kw  == feat[b, c, i*p+kh, j*p+kw]
    patches = feat.reshape(B, C, Hp, p, Wp, p)
    patches = patches.transpose(0, 2, 4, 1, 3, 5)            # (B, Hp, Wp, C, p, p)
    patches = patches.reshape(B * N, K)                       # (M, K), M = B*N
    w2d = proj_w.reshape(E, K).T                              # (K, E), same k ordering
    b2d = proj_b.reshape(1, E)

    M = B * N
    tm = min(tm, M)
    tn = min(tn, E)
    tk = min(tk, K)
    Mp = pl.cdiv(M, tm) * tm
    Ep = pl.cdiv(E, tn) * tn
    Kp = pl.cdiv(K, tk) * tk
    if Mp != M or Kp != K:
        patches = jnp.pad(patches, ((0, Mp - M), (0, Kp - K)))
    if Kp != K or Ep != E:
        w2d = jnp.pad(w2d, ((0, Kp - K), (0, Ep - E)))
    if Ep != E:
        b2d = jnp.pad(b2d, ((0, 0), (0, Ep - E)))

    grid = (Mp // tm, Ep // tn, Kp // tk)   # reduction (K) axis last, "arbitrary"
    out = pl.pallas_call(
        _proj_kernel,
        out_shape=jax.ShapeDtypeStruct((Mp, Ep), out_dtype),
        grid_spec=pltpu.PrefetchScalarGridSpec(
            num_scalar_prefetch=0,
            grid=grid,
            in_specs=[
                pl.BlockSpec((tm, tk), lambda i, j, k: (i, k)),   # patches (im2col)
                pl.BlockSpec((tk, tn), lambda i, j, k: (k, j)),   # projection weight
                pl.BlockSpec((1, tn), lambda i, j, k: (0, j)),    # projection bias
            ],
            out_specs=pl.BlockSpec((tm, tn), lambda i, j, k: (i, j)),
            scratch_shapes=[pltpu.VMEM((tm, tn), jnp.float32)],
        ),
        compiler_params=pltpu.CompilerParams(
            dimension_semantics=("parallel", "parallel", "arbitrary"),
            vmem_limit_bytes=48 * 1024 * 1024,
        ),
    )(patches, w2d, b2d)

    tokens = out[:M, :E].reshape(B, N, E)
    return tokens, (Hp, Wp)


def hybrid_embed_reference(feat, proj_w, proj_b, patch_size):
    """Pure-JAX reference: Conv2d(kernel=stride=p) -> flatten(2) -> transpose(1, 2)."""
    p = patch_size
    out = jax.lax.conv_general_dilated(
        feat, proj_w, window_strides=(p, p), padding="VALID",
        dimension_numbers=("NCHW", "OIHW", "NCHW"))
    out = out + proj_b[None, :, None, None]
    B, E, Hp, Wp = out.shape
    tokens = out.reshape(B, E, Hp * Wp).transpose(0, 2, 1)
    return tokens, (Hp, Wp)


if __name__ == "__main__":
    # Small shapes consistent with the module: the backbone feature map (B, C, H, W)
    # is projected with a Conv2d(kernel=stride=patch_size) to embed_dim tokens.
    B, C, H, W = 2, 32, 16, 16
    patch_size = 2
    embed_dim = 128

    key = jax.random.PRNGKey(0)
    kx, kw, kb = jax.random.split(key, 3)
    feat = jax.random.normal(kx, (B, C, H, W), dtype=jnp.float32)
    proj_w = (0.02 * jax.random.normal(
        kw, (embed_dim, C, patch_size, patch_size))).astype(jnp.float32)
    proj_b = (0.01 * jax.random.normal(kb, (embed_dim,))).astype(jnp.float32)

    tokens, hw = hybrid_embed_forward(feat, proj_w, proj_b, patch_size)
    tokens = jax.block_until_ready(tokens)

    ref_tokens, ref_hw = hybrid_embed_reference(feat, proj_w, proj_b, patch_size)
    N = (H // patch_size) * (W // patch_size)
    assert tokens.shape == (B, N, embed_dim)
    assert hw == ref_hw == (H // patch_size, W // patch_size)
    assert jnp.allclose(tokens, ref_tokens, rtol=1e-3, atol=1e-3)

    print("KERNEL_OK")
</pallas_src>

<mosaic_0001>
module attributes {stable_mosaic.version = 11 : i64} {
  func.func @_proj_kernel(%arg0: i32, %arg1: i32, %arg2: i32, %arg3: memref<128x128xf32, #tpu.memory_space<vmem>>, %arg4: memref<128x128xf32, #tpu.memory_space<vmem>>, %arg5: memref<1x128xf32, #tpu.memory_space<vmem>>, %arg6: memref<128x128xf32, #tpu.memory_space<vmem>>, %arg7: memref<128x128xf32, #tpu.memory_space<vmem>>) attributes {dimension_semantics = [#tpu.dimension_semantics<parallel>, #tpu.dimension_semantics<parallel>, #tpu.dimension_semantics<arbitrary>], iteration_bounds = array<i64: 1, 1, 1>, scalar_prefetch = 0 : i64, scratch_operands = 1 : i64, tpu.core_type = #tpu.core_type<tc>, window_params = [{transform_indices = @transform_0, window_bounds = array<i64: 128, 128>}, {transform_indices = @transform_1, window_bounds = array<i64: 128, 128>}, {transform_indices = @transform_2, window_bounds = array<i64: 1, 128>}, {transform_indices = @transform_3, window_bounds = array<i64: 128, 128>}]} {
    %c0_i32 = arith.constant 0 : i32
    %0 = arith.cmpi eq, %arg2, %c0_i32 : i32
    %1 = arith.extui %0 : i1 to i32
    %c0_i32_0 = arith.constant 0 : i32
    %2 = arith.cmpi ne, %1, %c0_i32_0 : i32
    scf.if %2 {
      %cst_10 = arith.constant 0.000000e+00 : f32
      %12 = vector.broadcast %cst_10 : f32 to vector<128x128xf32>
      %c0_11 = arith.constant 0 : index
      %c0_12 = arith.constant 0 : index
      %13 = vector.load %arg7[%c0_11, %c0_12] : memref<128x128xf32, #tpu.memory_space<vmem>>, vector<128x128xf32>
      tpu.vector_store %arg7[%c0_11, %c0_12], %12 {strides = array<i32>} : memref<128x128xf32, #tpu.memory_space<vmem>>, vector<128x128xf32>,
    } else {
    }
    %c0 = arith.constant 0 : index
    %c0_1 = arith.constant 0 : index
    %3 = vector.load %arg7[%c0, %c0_1] : memref<128x128xf32, #tpu.memory_space<vmem>>, vector<128x128xf32>
    %c0_2 = arith.constant 0 : index
    %c0_3 = arith.constant 0 : index
    %4 = vector.load %arg3[%c0_2, %c0_3] : memref<128x128xf32, #tpu.memory_space<vmem>>, vector<128x128xf32>
    %c0_4 = arith.constant 0 : index
    %c0_5 = arith.constant 0 : index
    %5 = vector.load %arg4[%c0_4, %c0_5] : memref<128x128xf32, #tpu.memory_space<vmem>>, vector<128x128xf32>
    %cst = arith.constant dense<0.000000e+00> : vector<128x128xf32>
    %6 = tpu.matmul %4, %5, %cst {dimension_numbers = #tpu.dot_dimension_numbers<[1], [0], [0], [1], [0, 0, 1, 1], [], []>} : vector<128x128xf32>, vector<128x128xf32>, vector<128x128xf32> -> vector<128x128xf32>
    %7 = arith.addf %3, %6 : vector<128x128xf32>
    %c0_6 = arith.constant 0 : index
    %c0_7 = arith.constant 0 : index
    %8 = vector.load %arg7[%c0_6, %c0_7] : memref<128x128xf32, #tpu.memory_space<vmem>>, vector<128x128xf32>
    tpu.vector_store %arg7[%c0_6, %c0_7], %7 {strides = array<i32>} : memref<128x128xf32, #tpu.memory_space<vmem>>, vector<128x128xf32>,
    %c0_i32_8 = arith.constant 0 : i32
    %9 = arith.cmpi eq, %arg2, %c0_i32_8 : i32
    %10 = arith.extui %9 : i1 to i32
    %c0_i32_9 = arith.constant 0 : i32
    %11 = arith.cmpi ne, %10, %c0_i32_9 : i32
    scf.if %11 {
      %c0_10 = arith.constant 0 : index
      %c0_11 = arith.constant 0 : index
      %12 = vector.load %arg7[%c0_10, %c0_11] : memref<128x128xf32, #tpu.memory_space<vmem>>, vector<128x128xf32>
      %c0_12 = arith.constant 0 : index
      %c0_13 = arith.constant 0 : index
      %13 = vector.load %arg5[%c0_12, %c0_13] : memref<1x128xf32, #tpu.memory_space<vmem>>, vector<1x128xf32>
      %14 = vector.shape_cast %13 : vector<1x128xf32> to vector<128xf32>
      %15 = vector.shape_cast %14 : vector<128xf32> to vector<1x128xf32>
      %16 = vector.broadcast %15 : vector<1x128xf32> to vector<128x128xf32>
      %17 = arith.addf %12, %16 : vector<128x128xf32>
      %c0_14 = arith.constant 0 : index
      %c0_15 = arith.constant 0 : index
      %18 = vector.load %arg6[%c0_14, %c0_15] : memref<128x128xf32, #tpu.memory_space<vmem>>, vector<128x128xf32>
      tpu.vector_store %arg6[%c0_14, %c0_15], %17 {strides = array<i32>} : memref<128x128xf32, #tpu.memory_space<vmem>>, vector<128x128xf32>,
    } else {
    }
    return
  }
  func.func @transform_0(%arg0: i32, %arg1: i32, %arg2: i32) -> (i32, i32) {
    %c0_i32 = arith.constant 0 : i32
    return %arg0, %arg2 : i32, i32
  }
  func.func @transform_1(%arg0: i32, %arg1: i32, %arg2: i32) -> (i32, i32) {
    %c0_i32 = arith.constant 0 : i32
    return %arg2, %arg1 : i32, i32
  }
  func.func @transform_2(%arg0: i32, %arg1: i32, %arg2: i32) -> (i32, i32) {
    %c0_i32 = arith.constant 0 : i32
    %c0_i32_0 = arith.constant 0 : i32
    return %c0_i32, %arg1 : i32, i32
  }
  func.func @transform_3(%arg0: i32, %arg1: i32, %arg2: i32) -> (i32, i32) {
    %c0_i32 = arith.constant 0 : i32
    return %arg0, %arg1 : i32, i32
  }
}

</mosaic_0001>

<bundles_post_ra>
// kernel: tpu_custom_call.1
= control target key start
LH: loop header
LB: loop body
LE: loop exit
PB: predicated region body
PF: predicated region fallthrough
CT: control target
= control target key end

     0   :  { %8 = vsyncpa [#allocation4], 0  ;;  %s465_s0 = inlined_call_operand.hbm [shape: f32[128,128], index: 0, kind: input, shape index: {}]   ;;  %s466_s1 = inlined_call_operand.hbm [shape: f32[128,128], index: 1, kind: input, shape index: {}]   ;;  %s467_s2 = inlined_call_operand.vmem [shape: f32[1,128], index: 2, kind: input, shape index: {}]   ;;  %s468_s3 = inlined_call_operand.hbm [shape: f32[128,128], index: 3, kind: output, shape index: {}]  }
   0x1   :  { %9 = vsyncpa [#allocation7], 0 }
   0x2   :  { %10 = vsyncpa [#allocation5], 0  ;;  %s15_s14 = sshll.u32 %s465_s0, 4  ;;  %s419_s15 = smov [#allocation3]   ;;  %s16_s14 = int_to_ptr.hbm [resolvable:$true] %s15_s14 }
   0x3   :  { %s17_s16 = sshll.u32 %s419_s15, 4  ;;  %s28_s19 = sshll.u32 %s466_s1, 4  ;;  %s18_s16 = int_to_ptr.vmem [resolvable:$true] %s17_s16  ;;  %s29_s19 = int_to_ptr.hbm [resolvable:$true] %s28_s19 }
   0x4   :  { %s420_s20 = smov 128   ;;  %s421_s21 = smov 8  }
   0x5   :  { %23 = dma.hbm_to_vmem [thread:$0]  %s16_s14, 2048, %s18_s16, [#allocation4], %s420_s20, %s420_s20, %s421_s21  }
   0x6   :  { %s422_s22 = smov [#allocation6]  }
   0x7   :  { %s30_s23 = sshll.u32 %s422_s22, 4  ;;  %s31_s23 = int_to_ptr.vmem [resolvable:$true] %s30_s23 }
   0x8   :  { %36 = dma.hbm_to_vmem [thread:$0]  %s29_s19, 2048, %s31_s23, [#allocation7], %s420_s20, %s420_s20, %s421_s21  }
   0x9   :  { %413 = dma.done.wait [#allocation4], 2048  }
   0xa   :  { %414 = vsyncadd [#allocation4], 4294965248 }
   0xb   :  { %415 = dma.done.wait [#allocation7], 2048  }
   0xc   :  { %416 = vsyncadd [#allocation7], 4294965248  ;;  %v114_v0 = vld [vmem:[#allocation6 + $0x78] sm:$0xff]  ;;  %v113_v1 = vld [vmem:[#allocation6 + $0x70] sm:$0xff]  ;;  %s273_s27 = sshll.u32 %s468_s3, 4  ;;  %s274_s27 = int_to_ptr.hbm [resolvable:$true] %s273_s27 }
   0xd   :  { %288 = vmatpush.msra.mxu2 %v114_v0  ;;  %289 = vmatpush.msra.mxu3 %v114_v0  ;;  %v112_v2 = vld [vmem:[#allocation6 + $0x68] sm:$0xff]  ;;  %v111_v3 = vld [vmem:[#allocation6 + $0x60] sm:$0xff]  ;;  %v110_v4 = vld [vmem:[#allocation6 + $0x58] sm:$0xff] }
   0xe   :  { %115 = vmatpush.msra.mxu0 %v114_v0  ;;  %287 = vmatpush.msra.mxu1 %v114_v0  ;;  %v109_v5 = vld [vmem:[#allocation6 + $0x50] sm:$0xff]  ;;  %v108_v6 = vld [vmem:[#allocation6 + $0x48] sm:$0xff]  ;;  %v107_v7 = vld [vmem:[#allocation6 + $0x40] sm:$0xff] }
   0xf   :  { %291 = vmatpush.msra.mxu2 %v113_v1  ;;  %292 = vmatpush.msra.mxu3 %v113_v1  ;;  %v106_v8 = vld [vmem:[#allocation6 + $0x38] sm:$0xff]  ;;  %v105_v9 = vld [vmem:[#allocation6 + $0x30] sm:$0xff]  ;;  %v104_v10 = vld [vmem:[#allocation6 + $0x28] sm:$0xff] }
  0x10   :  { %116 = vmatpush.msra.mxu0 %v113_v1  ;;  %290 = vmatpush.msra.mxu1 %v113_v1  ;;  %v103_v11 = vld [vmem:[#allocation6 + $0x20] sm:$0xff]  ;;  %v102_v12 = vld [vmem:[#allocation6 + $0x18] sm:$0xff]  ;;  %v101_v13 = vld [vmem:[#allocation6 + $0x10] sm:$0xff] }
  0x11   :  { %294 = vmatpush.msra.mxu2 %v112_v2  ;;  %295 = vmatpush.msra.mxu3 %v112_v2  ;;  %v100_v14 = vld [vmem:[#allocation6 + $0x8] sm:$0xff]  ;;  %v99_v15 = vld [vmem:[#allocation6] sm:$0xff]  ;;  %v93_v24 = vld [vmem:[#allocation3 + $0x50] sm:$0xff] }
  0x12   :  { %117 = vmatpush.msra.mxu0 %v112_v2  ;;  %293 = vmatpush.msra.mxu1 %v112_v2  ;;  %v91_v16 = vld [vmem:[#allocation3 + $0x40] sm:$0xff]  ;;  %v92_v20 = vld [vmem:[#allocation3 + $0x48] sm:$0xff]  ;;  %v97_v25 = vld [vmem:[#allocation3 + $0x70] sm:$0xff] }
  0x13   :  { %297 = vmatpush.msra.mxu2 %v111_v3  ;;  %298 = vmatpush.msra.mxu3 %v111_v3  ;;  %v95_v17 = vld [vmem:[#allocation3 + $0x60] sm:$0xff]  ;;  %v96_v21 = vld [vmem:[#allocation3 + $0x68] sm:$0xff]  ;;  %v85_v26 = vld [vmem:[#allocation3 + $0x10] sm:$0xff] }
  0x14   :  { %118 = vmatpush.msra.mxu0 %v111_v3  ;;  %296 = vmatpush.msra.mxu1 %v111_v3  ;;  %v83_v18 = vld [vmem:[#allocation3] sm:$0xff]  ;;  %v84_v22 = vld [vmem:[#allocation3 + $0x8] sm:$0xff]  ;;  %v89_v27 = vld [vmem:[#allocation3 + $0x30] sm:$0xff] }
  0x15   :  { %300 = vmatpush.msra.mxu2 %v110_v4  ;;  %301 = vmatpush.msra.mxu3 %v110_v4  ;;  %v87_v19 = vld [vmem:[#allocation3 + $0x20] sm:$0xff]  ;;  %v88_v23 = vld [vmem:[#allocation3 + $0x28] sm:$0xff]  ;;  %v94_v28 = vld [vmem:[#allocation3 + $0x58] sm:$0xff] }
  0x16   :  { %119 = vmatpush.msra.mxu0 %v110_v4  ;;  %299 = vmatpush.msra.mxu1 %v110_v4  ;;  %v98_v29 = vld [vmem:[#allocation3 + $0x78] sm:$0xff]  ;;  %v340_v32 = vld [vmem:[%s467_s2] ss:$0 sm:$0xff]  ;;  %s423_s2 = smov [#allocation8]  }
  0x17   :  { %303 = vmatpush.msra.mxu2 %v109_v5  ;;  %304 = vmatpush.msra.mxu3 %v109_v5  ;;  %v86_v30 = vld [vmem:[#allocation3 + $0x18] sm:$0xff]  ;;  %s271_s24 = sshll.u32 %s423_s2, 4  ;;  %s272_s24 = int_to_ptr.vmem [resolvable:$true] %s271_s24 }
  0x18   :  { %120 = vmatpush.msra.mxu0 %v109_v5  ;;  %302 = vmatpush.msra.mxu1 %v109_v5  ;;  %v90_v31 = vld [vmem:[#allocation3 + $0x38] sm:$0xff] }
  0x19   :  { %306 = vmatpush.msra.mxu2 %v108_v6  ;;  %307 = vmatpush.msra.mxu3 %v108_v6 }
  0x1a   :  { %121 = vmatpush.msra.mxu0 %v108_v6  ;;  %305 = vmatpush.msra.mxu1 %v108_v6 }
  0x1b   :  { %309 = vmatpush.msra.mxu2 %v107_v7  ;;  %310 = vmatpush.msra.mxu3 %v107_v7 }
  0x1c   :  { %122 = vmatpush.msra.mxu0 %v107_v7  ;;  %308 = vmatpush.msra.mxu1 %v107_v7 }
  0x1d   :  { %312 = vmatpush.msra.mxu2 %v106_v8  ;;  %313 = vmatpush.msra.mxu3 %v106_v8 }
  0x1e   :  { %123 = vmatpush.msra.mxu0 %v106_v8  ;;  %311 = vmatpush.msra.mxu1 %v106_v8 }
  0x1f   :  { %315 = vmatpush.msra.mxu2 %v105_v9  ;;  %316 = vmatpush.msra.mxu3 %v105_v9 }
  0x20   :  { %124 = vmatpush.msra.mxu0 %v105_v9  ;;  %314 = vmatpush.msra.mxu1 %v105_v9 }
  0x21   :  { %318 = vmatpush.msra.mxu2 %v104_v10  ;;  %319 = vmatpush.msra.mxu3 %v104_v10 }
  0x22   :  { %125 = vmatpush.msra.mxu0 %v104_v10  ;;  %317 = vmatpush.msra.mxu1 %v104_v10 }
  0x23   :  { %321 = vmatpush.msra.mxu2 %v103_v11  ;;  %322 = vmatpush.msra.mxu3 %v103_v11 }
  0x24   :  { %126 = vmatpush.msra.mxu0 %v103_v11  ;;  %320 = vmatpush.msra.mxu1 %v103_v11 }
  0x25   :  { %324 = vmatpush.msra.mxu2 %v102_v12  ;;  %325 = vmatpush.msra.mxu3 %v102_v12 }
  0x26   :  { %127 = vmatpush.msra.mxu0 %v102_v12  ;;  %323 = vmatpush.msra.mxu1 %v102_v12 }
  0x27   :  { %327 = vmatpush.msra.mxu2 %v101_v13  ;;  %328 = vmatpush.msra.mxu3 %v101_v13 }
  0x28   :  { %128 = vmatpush.msra.mxu0 %v101_v13  ;;  %326 = vmatpush.msra.mxu1 %v101_v13 }
  0x29   :  { %330 = vmatpush.msra.mxu2 %v100_v14  ;;  %331 = vmatpush.msra.mxu3 %v100_v14 }
  0x2a   :  { %129 = vmatpush.msra.mxu0 %v100_v14  ;;  %329 = vmatpush.msra.mxu1 %v100_v14 }
  0x2b   :  { %333 = vmatpush.msra.mxu2 %v99_v15  ;;  %334 = vmatpush.msra.mxu3 %v99_v15 }
  0x2c   :  { %155 = vmatmul.f32.vlgmr.msra.gmra.mxu2 %v91_v16  ;;  %167 = vmatmul.f32.vlgmr.msra.gmra.mxu3 %v95_v17 }
  0x2d   :  { %130 = vmatpush.msra.mxu0 %v99_v15  ;;  %332 = vmatpush.msra.mxu1 %v99_v15 }
  0x2e   :  { %131 = vmatmul.f32.vlgmr.msra.gmra.mxu0 %v83_v18  ;;  %143 = vmatmul.f32.vlgmr.msra.gmra.mxu1 %v87_v19 }
  0x34   :  { %158 = vmatmul.f32.gmra.mxu2 %v92_v20  ;;  %170 = vmatmul.f32.gmra.mxu3 %v96_v21 }
  0x36   :  { %134 = vmatmul.f32.gmra.mxu0 %v84_v22  ;;  %146 = vmatmul.f32.gmra.mxu1 %v88_v23 }
  0x3c   :  { %161 = vmatmul.f32.gmra.mxu2 %v93_v24  ;;  %173 = vmatmul.f32.gmra.mxu3 %v97_v25 }
  0x3e   :  { %137 = vmatmul.f32.gmra.mxu0 %v85_v26  ;;  %149 = vmatmul.f32.gmra.mxu1 %v89_v27 }
  0x44   :  { %164 = vmatmul.f32.gmra.mxu2 %v94_v28  ;;  %176 = vmatmul.f32.gmra.mxu3 %v98_v29 }
  0x46   :  { %140 = vmatmul.f32.gmra.mxu0 %v86_v30  ;;  %152 = vmatmul.f32.gmra.mxu1 %v90_v31 }
  0xab   :  { %v132_v33 = vpop.f32.mrf.mxu0  ;;  %v144_v34 = vpop.f32.mrf.mxu1 }
  0xac   :  { %v235_v35 = vadd.f32 %v340_v32, %v132_v33  ;;  %v239_v36 = vadd.f32 %v340_v32, %v144_v34 }
  0xae   :  { %251 = vst [vmem:[#allocation8] sm:$0xff] %v235_v35 }
  0xaf   :  { %255 = vst [vmem:[#allocation8 + $0x20] sm:$0xff] %v239_v36  ;;  %v156_v37 = vpop.f32.mrf.mxu2  ;;  %v168_v38 = vpop.f32.mrf.mxu3 }
  0xb0   :  { %v243_v39 = vadd.f32 %v340_v32, %v156_v37  ;;  %v247_v40 = vadd.f32 %v340_v32, %v168_v38 }
  0xb2   :  { %259 = vst [vmem:[#allocation8 + $0x40] sm:$0xff] %v243_v39 }
  0xb3   :  { %263 = vst [vmem:[#allocation8 + $0x60] sm:$0xff] %v247_v40  ;;  %v135_v41 = vpop.f32.mrf.mxu0  ;;  %v147_v42 = vpop.f32.mrf.mxu1 }
  0xb4   :  { %v236_v43 = vadd.f32 %v340_v32, %v135_v41  ;;  %v240_v44 = vadd.f32 %v340_v32, %v147_v42 }
  0xb6   :  { %252 = vst [vmem:[#allocation8 + $0x8] sm:$0xff] %v236_v43 }
  0xb7   :  { %256 = vst [vmem:[#allocation8 + $0x28] sm:$0xff] %v240_v44  ;;  %v159_v45 = vpop.f32.mrf.mxu2  ;;  %v171_v46 = vpop.f32.mrf.mxu3 }
  0xb8   :  { %v244_v47 = vadd.f32 %v340_v32, %v159_v45  ;;  %v248_v48 = vadd.f32 %v340_v32, %v171_v46 }
  0xba   :  { %260 = vst [vmem:[#allocation8 + $0x48] sm:$0xff] %v244_v47 }
  0xbb   :  { %264 = vst [vmem:[#allocation8 + $0x68] sm:$0xff] %v248_v48  ;;  %v138_v49 = vpop.f32.mrf.mxu0  ;;  %v150_v50 = vpop.f32.mrf.mxu1 }
  0xbc   :  { %v237_v51 = vadd.f32 %v340_v32, %v138_v49  ;;  %v241_v52 = vadd.f32 %v340_v32, %v150_v50 }
  0xbe   :  { %253 = vst [vmem:[#allocation8 + $0x10] sm:$0xff] %v237_v51 }
  0xbf   :  { %257 = vst [vmem:[#allocation8 + $0x30] sm:$0xff] %v241_v52  ;;  %v162_v53 = vpop.f32.mrf.mxu2  ;;  %v174_v54 = vpop.f32.mrf.mxu3 }
  0xc0   :  { %v245_v55 = vadd.f32 %v340_v32, %v162_v53  ;;  %v249_v56 = vadd.f32 %v340_v32, %v174_v54 }
  0xc2   :  { %261 = vst [vmem:[#allocation8 + $0x50] sm:$0xff] %v245_v55 }
  0xc3   :  { %265 = vst [vmem:[#allocation8 + $0x70] sm:$0xff] %v249_v56  ;;  %v141_v57 = vpop.f32.mrf.mxu0  ;;  %v153_v58 = vpop.f32.mrf.mxu1 }
  0xc4   :  { %v238_v59 = vadd.f32 %v340_v32, %v141_v57  ;;  %v242_v60 = vadd.f32 %v340_v32, %v153_v58 }
  0xc6   :  { %254 = vst [vmem:[#allocation8 + $0x18] sm:$0xff] %v238_v59 }
  0xc7   :  { %258 = vst [vmem:[#allocation8 + $0x38] sm:$0xff] %v242_v60  ;;  %v165_v61 = vpop.f32.mrf.mxu2  ;;  %v177_v62 = vpop.f32.mrf.mxu3 }
  0xc8   :  { %v246_v63 = vadd.f32 %v340_v32, %v165_v61  ;;  %v250_v0 = vadd.f32 %v340_v32, %v177_v62 }
  0xca   :  { %262 = vst [vmem:[#allocation8 + $0x58] sm:$0xff] %v246_v63 }
  0xcb   :  { %266 = vst [vmem:[#allocation8 + $0x78] sm:$0xff] %v250_v0 }
  0xcc   :  { %279 = dma.vmem_to_hbm [thread:$0]  %s272_s24, 2048, %s274_s27, [#allocation5], %s420_s20, %s420_s20, %s421_s21  }
  0xcd   :  { %417 = dma.done.wait [#allocation5], 2048  }
  0xce   :  { %418 = vsyncadd [#allocation5], 4294965248 }
  0xcf   :  { %284 = vsyncpa [#allocation4], 1 }
  0xd0   :  { %285 = vsyncpa [#allocation7], 1 }
  0xd1   :  { %286 = vsyncpa [#allocation5], 1 }

</bundles_post_ra>
